<compile_context>
chip_gen: v5e
topology: v5e:2x2
jax: 0.10.0
libtpu: 0.0.40
codegen_flags: <defaults>
</compile_context>

<pallas_src>
import bisect

import jax
import jax.numpy as jnp
from jax.experimental import pallas as pl
from jax.experimental.pallas import tpu as pltpu

# Small problem sizes consistent with the module's forward.
B = 2          # batch
E = 16         # encoder input dim (_Initial_part input_dim)
H = 32         # hidden state dim fed to m2
M = 16         # embedding dim (rows of encoder output matrix)
C = 64         # logsignature channels
T = 6          # logsig time steps
HID = 128      # _Initial_part hidden width (layers_dim=[HID])
TIME_LENGTH = 4.0


# ------------------------------ fused kernel --------------------------------

def _fused_forward_kernel(
    e0_ref, h0_ref,                          # VMEM (B,E) f32, (B,H) f32
    we1_ref, be1_ref,                        # encoder layer-1 (bf16 W, f32 b)
    ut_ref, vt_ref,                          # folded logsig*we2: (HID,B*M) bf16, (B,M) f32
    wm1_ref, bm1_ref, wm2_ref, bm2_ref,      # m2 layers (bf16 W, f32 b; layer2 m-major)
    dht_ref, det_ref,                        # VMEM outputs (B,H) f32, (B,M) f32
):
    f32, bf16 = jnp.float32, jnp.bfloat16

    # encoder layer 1: Linear -> ReLU   (bf16 MXU, f32 accumulate)
    a1 = jnp.maximum(
        jnp.dot(e0_ref[...].astype(bf16), we1_ref[...],
                preferred_element_type=f32) + be1_ref[...], 0.0)

    # det = a1 @ U_t (+ v_t):  U_t is the reset()-time fold of we2 with logsig,
    # stacked over batch along the output lanes -> ONE 2-D MXU matmul, then a
    # tiny diagonal-block select instead of a batch-2 / q=1 dot_general.
    full = jnp.dot(a1.astype(bf16), ut_ref[...],
                   preferred_element_type=f32)               # (B, B*M)
    row = jax.lax.broadcasted_iota(jnp.int32, (B, M), 0)
    det = vt_ref[...]
    for b in range(B):
        det = det + jnp.where(row == b, full[:, b * M:(b + 1) * M], 0.0)
    det_ref[...] = det                                       # (B, M)

    # m2: Linear -> ReLU -> Linear   (bf16 MXU, f32 accumulate)
    a2 = jnp.maximum(
        jnp.dot(h0_ref[...].astype(bf16), wm1_ref[...],
                preferred_element_type=f32) + bm1_ref[...], 0.0)
    # wm2 was relaid out m-major on the host: m2_flat[b, m*H + h] = m2(h0)[b, h, m]
    m2_flat = jnp.dot(a2.astype(bf16), wm2_ref[...],
                      preferred_element_type=f32) + bm2_ref[...]   # (B, M*H)

    # dht[b,h] = sum_m det[b,m] * m2_flat[b, m*H+h]
    # Lane-dense strided accumulation: no (B,M*H)->(B,M,H) relayout, no batched
    # einsum (which would unroll into per-batch MXU weight pushes).
    dht = jnp.zeros((B, H), f32)
    for m in range(M):
        dht = dht + det[:, m:m + 1] * m2_flat[:, m * H:(m + 1) * H]
    dht_ref[...] = dht                                       # (B, H)


def fused_wrapper_forward(e0, h0, u_t, v_t, we1, be1, wm1, bm1, wm2_mh, bm2_mh):
    """One pallas_call for the whole Wrapper.forward (both MLPs + both contractions)."""
    vmem = pl.BlockSpec(memory_space=pltpu.MemorySpace.VMEM)
    dht, det = pl.pallas_call(
        _fused_forward_kernel,
        out_shape=(jax.ShapeDtypeStruct((B, H), jnp.float32),
                   jax.ShapeDtypeStruct((B, M), jnp.float32)),
        in_specs=[vmem] * 10,
        out_specs=(vmem, vmem),
    )(e0, h0, we1, be1, u_t, v_t, wm1, bm1, wm2_mh, bm2_mh)
    return dht, det


@jax.jit
def _forward_impl(t, time_mul_factor, e0, h0, u_stack, v_tbm,
                  we1, be1, wm1, bm1, wm2_mh, bm2_mh):
    """Index computation + table slice + fused kernel, under one jit."""
    tn = v_tbm.shape[0]
    # Replicates bisect.bisect(range(T), t*factor) - 1, with torch-style
    # negative-index wrap for t*factor < 0.
    v = jnp.asarray(t, jnp.float32) * jnp.asarray(time_mul_factor, jnp.float32)
    idx = jnp.clip(jnp.floor(v).astype(jnp.int32), -1, tn - 1)
    idx = jnp.where(idx < 0, idx + tn, idx)
    # Data-dependent slice done OUTSIDE the kernel (cheap XLA dynamic-slice).
    u_t = jax.lax.dynamic_index_in_dim(u_stack, idx, axis=0, keepdims=False)
    v_t = jax.lax.dynamic_index_in_dim(v_tbm, idx, axis=0, keepdims=False)
    return fused_wrapper_forward(e0, h0, u_t, v_t,
                                 we1, be1, wm1, bm1, wm2_mh, bm2_mh)


# ------------------------------ Wrapper port ---------------------------------

class PallasWrapper:
    """JAX/Pallas port of lord/emb_func.py::Wrapper built on _Initial_part MLPs."""

    def __init__(self, encoder_params, m2_params, m2_dec=False):
        # encoder_params / m2_params in the original torch (row-major) layout:
        #   (W1:(in,HID), b1:(1,HID), W2:(HID, rows*cols), b2:(1, rows*cols))
        w1, b1, w2, b2 = encoder_params
        v1, c1, v2, c2 = m2_params

        # Encoder: keep layer-2 weights raw; they get folded into logsig at reset().
        self.we1 = w1.astype(jnp.bfloat16)
        self.be1 = b1.astype(jnp.float32)
        self.we2_3d = w2.reshape(w2.shape[0], M, C).astype(jnp.float32)   # [k, m, c]
        self.be2_2d = b2.reshape(M, C).astype(jnp.float32)                # [m, c]

        # m2: relayout layer-2 to m-major (so m2_flat[b, m*H+h] = m2(h)[b,h,m])
        # and cast weights to bf16 (halves HBM->VMEM bytes and MXU push work).
        hid2 = v2.shape[0]
        n_rows = v2.shape[1] // M            # = H in this configuration
        wm2_mh = v2.reshape(hid2, n_rows, M).transpose(0, 2, 1).reshape(hid2, M * n_rows)
        bm2_mh = c2.reshape(1, n_rows, M).transpose(0, 2, 1).reshape(1, M * n_rows)
        self.wm1 = v1.astype(jnp.bfloat16)
        self.bm1 = c1.astype(jnp.float32)
        self.wm2_mh = wm2_mh.astype(jnp.bfloat16)
        self.bm2_mh = bm2_mh.astype(jnp.float32)

        self.m2_dec = m2_dec
        self.U_stack = None
        self.v_tbm = None
        self.tn = 1
        self.time_mul_factor = 1.0

    def reset(self, logsig, time_length):
        # Fold encoder layer-2 into the (fixed-between-resets) logsignature:
        #   U[t, k, b*M+m] = sum_c logsig[b,t,c] * we2[k, m, c]
        #   v[t, b, m]     = sum_c logsig[b,t,c] * be2[m, c]
        # ~100 KB total (bf16), computed once per reset at full f32 precision.
        hp = jax.lax.Precision.HIGHEST
        U = jnp.einsum("btc,kmc->tkbm", logsig, self.we2_3d, precision=hp)
        self.U_stack = U.reshape(logsig.shape[1], HID, B * M).astype(jnp.bfloat16)
        self.v_tbm = jnp.einsum("btc,mc->tbm", logsig, self.be2_2d,
                                precision=hp).astype(jnp.float32)
        self.tn = logsig.shape[1]
        self.time_mul_factor = (
            1.0 if time_length is None else (logsig.shape[1] + 1) / time_length
        )

    def forward(self, t, x):
        if not self.m2_dec:
            h0, e0 = x[0], x[1]
            dht_dt, det_dt = _forward_impl(
                t, self.time_mul_factor, e0, h0, self.U_stack, self.v_tbm,
                self.we1, self.be1, self.wm1, self.bm1, self.wm2_mh, self.bm2_mh)
            return dht_dt, det_dt
        else:
            e0, s0 = x[0], x[1]
            dst_dt, det_dt = _forward_impl(
                t, self.time_mul_factor, e0, s0, self.U_stack, self.v_tbm,
                self.we1, self.be1, self.wm1, self.bm1, self.wm2_mh, self.bm2_mh)
            return det_dt, dst_dt


# ------------------------------ Reference ------------------------------------

def reference_forward(t, x, enc_params, m2_params, logsig, time_length):
    """Pure-JAX high-precision reference with the ORIGINAL (non-relayouted) f32 weights."""
    h0, e0 = x
    w1, b1, w2, b2 = enc_params
    v1, c1, v2, c2 = m2_params
    hp = jax.lax.Precision.HIGHEST
    a1 = jnp.maximum(jnp.dot(e0, w1, precision=hp) + b1, 0.0)
    enc = (jnp.dot(a1, w2, precision=hp) + b2).reshape(B, M, C)
    a2 = jnp.maximum(jnp.dot(h0, v1, precision=hp) + c1, 0.0)
    main = (jnp.dot(a2, v2, precision=hp) + c2).reshape(B, H, M)

    factor = (logsig.shape[1] + 1) / time_length
    idx = bisect.bisect(range(logsig.shape[1]), float(t) * factor) - 1
    if idx < 0:
        idx += logsig.shape[1]
    ls_t = logsig[:, idx]                                # (B, C)

    det = jnp.einsum("bmc,bc->bm", enc, ls_t, precision=hp)
    dht = jnp.einsum("bhm,bm->bh", main, det, precision=hp)
    return dht, det


if __name__ == "__main__":
    key = jax.random.PRNGKey(0)
    ks = jax.random.split(key, 11)
    h0 = jax.random.normal(ks[0], (B, H), jnp.float32)
    e0 = jax.random.normal(ks[1], (B, E), jnp.float32)
    logsig = jax.random.normal(ks[2], (B, T, C), jnp.float32)

    # encoder _Initial_part(E -> M*C, layers_dim=[HID]): Linear, ReLU, Linear
    w_e1 = jax.random.normal(ks[3], (E, HID), jnp.float32) * 0.1
    b_e1 = jax.random.normal(ks[4], (1, HID), jnp.float32) * 0.1
    w_e2 = jax.random.normal(ks[5], (HID, M * C), jnp.float32) * 0.1
    b_e2 = jax.random.normal(ks[6], (1, M * C), jnp.float32) * 0.1
    # m2 _Initial_part(H -> H*M, layers_dim=[HID]): Linear, ReLU, Linear
    w_m1 = jax.random.normal(ks[7], (H, HID), jnp.float32) * 0.1
    b_m1 = jax.random.normal(ks[8], (1, HID), jnp.float32) * 0.1
    w_m2 = jax.random.normal(ks[9], (HID, H * M), jnp.float32) * 0.1
    b_m2 = jax.random.normal(ks[10], (1, H * M), jnp.float32) * 0.1
    # TODO(synk): nn.Dropout (training mode) is not modeled; eval-mode identity assumed.

    enc_params = (w_e1, b_e1, w_e2, b_e2)
    m2_params = (w_m1, b_m1, w_m2, b_m2)

    wrapper = PallasWrapper(enc_params, m2_params, m2_dec=False)
    wrapper.reset(logsig, TIME_LENGTH)

    t = 1.7
    dht_dt, det_dt = wrapper.forward(t, (h0, e0))
    jax.block_until_ready((dht_dt, det_dt))

    dht_ref, det_ref = reference_forward(
        t, (h0, e0), enc_params, m2_params, logsig, TIME_LENGTH)
    assert dht_dt.shape == (B, H) and det_dt.shape == (B, M)
    # Tolerance covers bf16 MXU passes in the kernel vs the f32-HIGHEST reference;
    # structural bugs (wrong transpose/index) would produce O(1)-relative errors.
    ok = bool(
        jnp.allclose(dht_dt, dht_ref, rtol=5e-2, atol=5e-2)
        and jnp.allclose(det_dt, det_ref, rtol=5e-2, atol=5e-2)
    )
    if not ok:
        raise SystemExit("mismatch vs reference")
    print("KERNEL_OK")
</pallas_src>

<mosaic_0001>
module attributes {stable_mosaic.version = 11 : i64} {
  func.func @_fused_forward_kernel(%arg0: memref<2x16xf32, #tpu.memory_space<vmem>>, %arg1: memref<2x32xf32, #tpu.memory_space<vmem>>, %arg2: memref<16x128xbf16, #tpu.memory_space<vmem>>, %arg3: memref<1x128xf32, #tpu.memory_space<vmem>>, %arg4: memref<128x32xbf16, #tpu.memory_space<vmem>>, %arg5: memref<2x16xf32, #tpu.memory_space<vmem>>, %arg6: memref<32x128xbf16, #tpu.memory_space<vmem>>, %arg7: memref<1x128xf32, #tpu.memory_space<vmem>>, %arg8: memref<128x512xbf16, #tpu.memory_space<vmem>>, %arg9: memref<1x512xf32, #tpu.memory_space<vmem>>, %arg10: memref<2x32xf32, #tpu.memory_space<vmem>>, %arg11: memref<2x16xf32, #tpu.memory_space<vmem>>) attributes {dimension_semantics = [], scalar_prefetch = 0 : i64, scratch_operands = 0 : i64, tpu.core_type = #tpu.core_type<tc>} {
    %c0 = arith.constant 0 : index
    %c0_0 = arith.constant 0 : index
    %0 = vector.load %arg0[%c0, %c0_0] : memref<2x16xf32, #tpu.memory_space<vmem>>, vector<2x16xf32>
    %1 = arith.truncf %0 : vector<2x16xf32> to vector<2x16xbf16>
    %c0_1 = arith.constant 0 : index
    %c0_2 = arith.constant 0 : index
    %2 = vector.load %arg2[%c0_1, %c0_2] : memref<16x128xbf16, #tpu.memory_space<vmem>>, vector<16x128xbf16>
    %cst = arith.constant dense<0.000000e+00> : vector<2x128xf32>
    %3 = tpu.matmul %1, %2, %cst {dimension_numbers = #tpu.dot_dimension_numbers<[1], [0], [0], [1], [0, 0, 1, 1], [], []>} : vector<2x16xbf16>, vector<16x128xbf16>, vector<2x128xf32> -> vector<2x128xf32>
    %c0_3 = arith.constant 0 : index
    %c0_4 = arith.constant 0 : index
    %4 = vector.load %arg3[%c0_3, %c0_4] : memref<1x128xf32, #tpu.memory_space<vmem>>, vector<1x128xf32>
    %5 = vector.broadcast %4 : vector<1x128xf32> to vector<2x128xf32>
    %6 = arith.addf %3, %5 : vector<2x128xf32>
    %cst_5 = arith.constant 0.000000e+00 : f32
    %7 = vector.broadcast %cst_5 : f32 to vector<2x128xf32>
    %8 = arith.maximumf %6, %7 : vector<2x128xf32>
    %9 = arith.truncf %8 : vector<2x128xf32> to vector<2x128xbf16>
    %c0_6 = arith.constant 0 : index
    %c0_7 = arith.constant 0 : index
    %10 = vector.load %arg4[%c0_6, %c0_7] : memref<128x32xbf16, #tpu.memory_space<vmem>>, vector<128x32xbf16>
    %cst_8 = arith.constant dense<0.000000e+00> : vector<2x32xf32>
    %11 = tpu.matmul %9, %10, %cst_8 {dimension_numbers = #tpu.dot_dimension_numbers<[1], [0], [0], [1], [0, 0, 1, 1], [], []>} : vector<2x128xbf16>, vector<128x32xbf16>, vector<2x32xf32> -> vector<2x32xf32>
    %12 = tpu.iota {dimensions = array<i32: 0>} : vector<2x16xi32>
    %c0_9 = arith.constant 0 : index
    %c0_10 = arith.constant 0 : index
    %13 = vector.load %arg5[%c0_9, %c0_10] : memref<2x16xf32, #tpu.memory_space<vmem>>, vector<2x16xf32>
    %c0_i32 = arith.constant 0 : i32
    %14 = vector.broadcast %c0_i32 : i32 to vector<2x16xi32>
    %15 = arith.cmpi eq, %12, %14 : vector<2x16xi32>
    %16 = vector.extract_strided_slice %11 {offsets = [0, 0], sizes = [2, 16], strides = [1, 1]} : vector<2x32xf32> to vector<2x16xf32>
    %cst_11 = arith.constant 0.000000e+00 : f32
    %17 = vector.broadcast %cst_11 : f32 to vector<2x16xf32>
    %18 = arith.select %15, %16, %17 : vector<2x16xi1>, vector<2x16xf32>
    %19 = arith.addf %13, %18 : vector<2x16xf32>
    %c1_i32 = arith.constant 1 : i32
    %20 = vector.broadcast %c1_i32 : i32 to vector<2x16xi32>
    %21 = arith.cmpi eq, %12, %20 : vector<2x16xi32>
    %22 = vector.extract_strided_slice %11 {offsets = [0, 16], sizes = [2, 16], strides = [1, 1]} : vector<2x32xf32> to vector<2x16xf32>
    %cst_12 = arith.constant 0.000000e+00 : f32
    %23 = vector.broadcast %cst_12 : f32 to vector<2x16xf32>
    %24 = arith.select %21, %22, %23 : vector<2x16xi1>, vector<2x16xf32>
    %25 = arith.addf %19, %24 : vector<2x16xf32>
    %c0_13 = arith.constant 0 : index
    %c0_14 = arith.constant 0 : index
    %26 = vector.load %arg11[%c0_13, %c0_14] : memref<2x16xf32, #tpu.memory_space<vmem>>, vector<2x16xf32>
    tpu.vector_store %arg11[%c0_13, %c0_14], %25 {strides = array<i32>} : memref<2x16xf32, #tpu.memory_space<vmem>>, vector<2x16xf32>,
    %c0_15 = arith.constant 0 : index
    %c0_16 = arith.constant 0 : index
    %27 = vector.load %arg1[%c0_15, %c0_16] : memref<2x32xf32, #tpu.memory_space<vmem>>, vector<2x32xf32>
    %28 = arith.truncf %27 : vector<2x32xf32> to vector<2x32xbf16>
    %c0_17 = arith.constant 0 : index
    %c0_18 = arith.constant 0 : index
    %29 = vector.load %arg6[%c0_17, %c0_18] : memref<32x128xbf16, #tpu.memory_space<vmem>>, vector<32x128xbf16>
    %cst_19 = arith.constant dense<0.000000e+00> : vector<2x128xf32>
    %30 = tpu.matmul %28, %29, %cst_19 {dimension_numbers = #tpu.dot_dimension_numbers<[1], [0], [0], [1], [0, 0, 1, 1], [], []>} : vector<2x32xbf16>, vector<32x128xbf16>, vector<2x128xf32> -> vector<2x128xf32>
    %c0_20 = arith.constant 0 : index
    %c0_21 = arith.constant 0 : index
    %31 = vector.load %arg7[%c0_20, %c0_21] : memref<1x128xf32, #tpu.memory_space<vmem>>, vector<1x128xf32>
    %32 = vector.broadcast %31 : vector<1x128xf32> to vector<2x128xf32>
    %33 = arith.addf %30, %32 : vector<2x128xf32>
    %cst_22 = arith.constant 0.000000e+00 : f32
    %34 = vector.broadcast %cst_22 : f32 to vector<2x128xf32>
    %35 = arith.maximumf %33, %34 : vector<2x128xf32>
    %36 = arith.truncf %35 : vector<2x128xf32> to vector<2x128xbf16>
    %c0_23 = arith.constant 0 : index
    %c0_24 = arith.constant 0 : index
    %37 = vector.load %arg8[%c0_23, %c0_24] : memref<128x512xbf16, #tpu.memory_space<vmem>>, vector<128x512xbf16>
    %cst_25 = arith.constant dense<0.000000e+00> : vector<2x512xf32>
    %38 = tpu.matmul %36, %37, %cst_25 {dimension_numbers = #tpu.dot_dimension_numbers<[1], [0], [0], [1], [0, 0, 1, 1], [], []>} : vector<2x128xbf16>, vector<128x512xbf16>, vector<2x512xf32> -> vector<2x512xf32>
    %c0_26 = arith.constant 0 : index
    %c0_27 = arith.constant 0 : index
    %39 = vector.load %arg9[%c0_26, %c0_27] : memref<1x512xf32, #tpu.memory_space<vmem>>, vector<1x512xf32>
    %40 = vector.broadcast %39 : vector<1x512xf32> to vector<2x512xf32>
    %41 = arith.addf %38, %40 : vector<2x512xf32>
    %cst_28 = arith.constant 0.000000e+00 : f32
    %42 = vector.broadcast %cst_28 : f32 to vector<2x32xf32>
    %43 = vector.extract_strided_slice %25 {offsets = [0, 0], sizes = [2, 1], strides = [1, 1]} : vector<2x16xf32> to vector<2x1xf32>
    %44 = vector.extract_strided_slice %41 {offsets = [0, 0], sizes = [2, 32], strides = [1, 1]} : vector<2x512xf32> to vector<2x32xf32>
    %45 = vector.broadcast %43 : vector<2x1xf32> to vector<2x32xf32>
    %46 = arith.mulf %45, %44 : vector<2x32xf32>
    %47 = arith.addf %42, %46 : vector<2x32xf32>
    %48 = vector.extract_strided_slice %25 {offsets = [0, 1], sizes = [2, 1], strides = [1, 1]} : vector<2x16xf32> to vector<2x1xf32>
    %49 = vector.extract_strided_slice %41 {offsets = [0, 32], sizes = [2, 32], strides = [1, 1]} : vector<2x512xf32> to vector<2x32xf32>
    %50 = vector.broadcast %48 : vector<2x1xf32> to vector<2x32xf32>
    %51 = arith.mulf %50, %49 : vector<2x32xf32>
    %52 = arith.addf %47, %51 : vector<2x32xf32>
    %53 = vector.extract_strided_slice %25 {offsets = [0, 2], sizes = [2, 1], strides = [1, 1]} : vector<2x16xf32> to vector<2x1xf32>
    %54 = vector.extract_strided_slice %41 {offsets = [0, 64], sizes = [2, 32], strides = [1, 1]} : vector<2x512xf32> to vector<2x32xf32>
    %55 = vector.broadcast %53 : vector<2x1xf32> to vector<2x32xf32>
    %56 = arith.mulf %55, %54 : vector<2x32xf32>
    %57 = arith.addf %52, %56 : vector<2x32xf32>
    %58 = vector.extract_strided_slice %25 {offsets = [0, 3], sizes = [2, 1], strides = [1, 1]} : vector<2x16xf32> to vector<2x1xf32>
    %59 = vector.extract_strided_slice %41 {offsets = [0, 96], sizes = [2, 32], strides = [1, 1]} : vector<2x512xf32> to vector<2x32xf32>
    %60 = vector.broadcast %58 : vector<2x1xf32> to vector<2x32xf32>
    %61 = arith.mulf %60, %59 : vector<2x32xf32>
    %62 = arith.addf %57, %61 : vector<2x32xf32>
    %63 = vector.extract_strided_slice %25 {offsets = [0, 4], sizes = [2, 1], strides = [1, 1]} : vector<2x16xf32> to vector<2x1xf32>
    %64 = vector.extract_strided_slice %41 {offsets = [0, 128], sizes = [2, 32], strides = [1, 1]} : vector<2x512xf32> to vector<2x32xf32>
    %65 = vector.broadcast %63 : vector<2x1xf32> to vector<2x32xf32>
    %66 = arith.mulf %65, %64 : vector<2x32xf32>
    %67 = arith.addf %62, %66 : vector<2x32xf32>
    %68 = vector.extract_strided_slice %25 {offsets = [0, 5], sizes = [2, 1], strides = [1, 1]} : vector<2x16xf32> to vector<2x1xf32>
    %69 = vector.extract_strided_slice %41 {offsets = [0, 160], sizes = [2, 32], strides = [1, 1]} : vector<2x512xf32> to vector<2x32xf32>
    %70 = vector.broadcast %68 : vector<2x1xf32> to vector<2x32xf32>
    %71 = arith.mulf %70, %69 : vector<2x32xf32>
    %72 = arith.addf %67, %71 : vector<2x32xf32>
    %73 = vector.extract_strided_slice %25 {offsets = [0, 6], sizes = [2, 1], strides = [1, 1]} : vector<2x16xf32> to vector<2x1xf32>
    %74 = vector.extract_strided_slice %41 {offsets = [0, 192], sizes = [2, 32], strides = [1, 1]} : vector<2x512xf32> to vector<2x32xf32>
    %75 = vector.broadcast %73 : vector<2x1xf32> to vector<2x32xf32>
    %76 = arith.mulf %75, %74 : vector<2x32xf32>
    %77 = arith.addf %72, %76 : vector<2x32xf32>
    %78 = vector.extract_strided_slice %25 {offsets = [0, 7], sizes = [2, 1], strides = [1, 1]} : vector<2x16xf32> to vector<2x1xf32>
    %79 = vector.extract_strided_slice %41 {offsets = [0, 224], sizes = [2, 32], strides = [1, 1]} : vector<2x512xf32> to vector<2x32xf32>
    %80 = vector.broadcast %78 : vector<2x1xf32> to vector<2x32xf32>
    %81 = arith.mulf %80, %79 : vector<2x32xf32>
    %82 = arith.addf %77, %81 : vector<2x32xf32>
    %83 = vector.extract_strided_slice %25 {offsets = [0, 8], sizes = [2, 1], strides = [1, 1]} : vector<2x16xf32> to vector<2x1xf32>
    %84 = vector.extract_strided_slice %41 {offsets = [0, 256], sizes = [2, 32], strides = [1, 1]} : vector<2x512xf32> to vector<2x32xf32>
    %85 = vector.broadcast %83 : vector<2x1xf32> to vector<2x32xf32>
    %86 = arith.mulf %85, %84 : vector<2x32xf32>
    %87 = arith.addf %82, %86 : vector<2x32xf32>
    %88 = vector.extract_strided_slice %25 {offsets = [0, 9], sizes = [2, 1], strides = [1, 1]} : vector<2x16xf32> to vector<2x1xf32>
    %89 = vector.extract_strided_slice %41 {offsets = [0, 288], sizes = [2, 32], strides = [1, 1]} : vector<2x512xf32> to vector<2x32xf32>
    %90 = vector.broadcast %88 : vector<2x1xf32> to vector<2x32xf32>
    %91 = arith.mulf %90, %89 : vector<2x32xf32>
    %92 = arith.addf %87, %91 : vector<2x32xf32>
    %93 = vector.extract_strided_slice %25 {offsets = [0, 10], sizes = [2, 1], strides = [1, 1]} : vector<2x16xf32> to vector<2x1xf32>
    %94 = vector.extract_strided_slice %41 {offsets = [0, 320], sizes = [2, 32], strides = [1, 1]} : vector<2x512xf32> to vector<2x32xf32>
    %95 = vector.broadcast %93 : vector<2x1xf32> to vector<2x32xf32>
    %96 = arith.mulf %95, %94 : vector<2x32xf32>
    %97 = arith.addf %92, %96 : vector<2x32xf32>
    %98 = vector.extract_strided_slice %25 {offsets = [0, 11], sizes = [2, 1], strides = [1, 1]} : vector<2x16xf32> to vector<2x1xf32>
    %99 = vector.extract_strided_slice %41 {offsets = [0, 352], sizes = [2, 32], strides = [1, 1]} : vector<2x512xf32> to vector<2x32xf32>
    %100 = vector.broadcast %98 : vector<2x1xf32> to vector<2x32xf32>
    %101 = arith.mulf %100, %99 : vector<2x32xf32>
    %102 = arith.addf %97, %101 : vector<2x32xf32>
    %103 = vector.extract_strided_slice %25 {offsets = [0, 12], sizes = [2, 1], strides = [1, 1]} : vector<2x16xf32> to vector<2x1xf32>
    %104 = vector.extract_strided_slice %41 {offsets = [0, 384], sizes = [2, 32], strides = [1, 1]} : vector<2x512xf32> to vector<2x32xf32>
    %105 = vector.broadcast %103 : vector<2x1xf32> to vector<2x32xf32>
    %106 = arith.mulf %105, %104 : vector<2x32xf32>
    %107 = arith.addf %102, %106 : vector<2x32xf32>
    %108 = vector.extract_strided_slice %25 {offsets = [0, 13], sizes = [2, 1], strides = [1, 1]} : vector<2x16xf32> to vector<2x1xf32>
    %109 = vector.extract_strided_slice %41 {offsets = [0, 416], sizes = [2, 32], strides = [1, 1]} : vector<2x512xf32> to vector<2x32xf32>
    %110 = vector.broadcast %108 : vector<2x1xf32> to vector<2x32xf32>
    %111 = arith.mulf %110, %109 : vector<2x32xf32>
    %112 = arith.addf %107, %111 : vector<2x32xf32>
    %113 = vector.extract_strided_slice %25 {offsets = [0, 14], sizes = [2, 1], strides = [1, 1]} : vector<2x16xf32> to vector<2x1xf32>
    %114 = vector.extract_strided_slice %41 {offsets = [0, 448], sizes = [2, 32], strides = [1, 1]} : vector<2x512xf32> to vector<2x32xf32>
    %115 = vector.broadcast %113 : vector<2x1xf32> to vector<2x32xf32>
    %116 = arith.mulf %115, %114 : vector<2x32xf32>
    %117 = arith.addf %112, %116 : vector<2x32xf32>
    %118 = vector.extract_strided_slice %25 {offsets = [0, 15], sizes = [2, 1], strides = [1, 1]} : vector<2x16xf32> to vector<2x1xf32>
    %119 = vector.extract_strided_slice %41 {offsets = [0, 480], sizes = [2, 32], strides = [1, 1]} : vector<2x512xf32> to vector<2x32xf32>
    %120 = vector.broadcast %118 : vector<2x1xf32> to vector<2x32xf32>
    %121 = arith.mulf %120, %119 : vector<2x32xf32>
    %122 = arith.addf %117, %121 : vector<2x32xf32>
    %c0_29 = arith.constant 0 : index
    %c0_30 = arith.constant 0 : index
    %123 = vector.load %arg10[%c0_29, %c0_30] : memref<2x32xf32, #tpu.memory_space<vmem>>, vector<2x32xf32>
    tpu.vector_store %arg10[%c0_29, %c0_30], %122 {strides = array<i32>} : memref<2x32xf32, #tpu.memory_space<vmem>>, vector<2x32xf32>,
    return
  }
}

</mosaic_0001>

<bundles_post_ra>
// kernel: _forward_impl.1
= control target key start
LH: loop header
LB: loop body
LE: loop exit
PB: predicated region body
PF: predicated region fallthrough
CT: control target
= control target key end

     0   :  { %17 = vsyncpa [#allocation3], 0  ;;  %s1173_s0 = inlined_call_operand.vmem [shape: f32[2,16], index: 0, kind: input, shape index: {}]   ;;  %s1174_s1 = inlined_call_operand.vmem [shape: f32[2,32], index: 1, kind: input, shape index: {}]   ;;  %s1175_s2 = inlined_call_operand.vmem [shape: bf16[16,128], index: 2, kind: input, shape index: {}]   ;;  %s1176_s3 = inlined_call_operand.vmem [shape: f32[1,128], index: 3, kind: input, shape index: {}]   ;;  %s1177_s4 = inlined_call_operand.vmem [shape: bf16[128,32], index: 4, kind: input, shape index: {}]   ;;  %s1178_s5 = inlined_call_operand.vmem [shape: f32[2,16], index: 5, kind: input, shape index: {}]   ;;  %s1179_s6 = inlined_call_operand.vmem [shape: bf16[32,128], index: 6, kind: input, shape index: {}]   ;;  %s1180_s7 = inlined_call_operand.vmem [shape: f32[1,128], index: 7, kind: input, shape index: {}]   ;;  %s1181_s8 = inlined_call_operand.hbm [shape: bf16[128,512], index: 8, kind: input, shape index: {}]   ;;  %s1182_s9 = inlined_call_operand.vmem [shape: f32[1,512], index: 9, kind: input, shape index: {}]   ;;  %s1183_s10 = inlined_call_operand.hbm [shape: f32[2,32], index: 10, kind: output, shape index: {0}]   ;;  %s1184_s11 = inlined_call_operand.hbm [shape: f32[2,16], index: 11, kind: output, shape index: {1}]  }
   0x1   :  { %18 = vsyncpa [#allocation4], 0 }
   0x2   :  { %19 = vsyncpa [#allocation7], 0  ;;  %s40_s19 = sshll.u32 %s1181_s8, 4  ;;  %s995_s20 = smov [#allocation2]   ;;  %s41_s19 = int_to_ptr.hbm [resolvable:$true] %s40_s19 }
   0x3   :  { %s42_s21 = sshll.u32 %s995_s20, 4  ;;  %s996_s22 = smov 256   ;;  %s43_s21 = int_to_ptr.vmem [resolvable:$true] %s42_s21 }
   0x4   :  { %s997_s23 = smov 16  }
   0x5   :  { %48 = dma.hbm_to_vmem [thread:$0]  %s41_s19, 4096, %s43_s21, [#allocation3], %s996_s22, %s996_s22, %s997_s23  }
   0x6   :  { %989 = dma.done.wait [#allocation3], 4096  }
   0x7   :  { %990 = vsyncadd [#allocation3], 4294963200  ;;  %v830_v0 = vld [vmem:[%s1175_s2] sm:$0xff]  ;;  %v838_v2 = vld [vmem:[%s1177_s4 + $0x38] sm:$0xff]  ;;  %vm70_vm0 = vcmask 130048   ;;  %vm203_vm1 = vcmask 261120  }
   0x8   :  { %v56_v1 = vld [vmem:[%s1173_s0] sm:$0x3]  ;;  %81 = vmatpush.bf16.msra.mxu0 %v830_v0  ;;  %153 = vmatpush.bf16.msra.mxu1 %v838_v2  ;;  %v837_v4 = vld [vmem:[%s1177_s4 + $0x30] sm:$0xff]  ;;  %v836_v5 = vld [vmem:[%s1177_s4 + $0x28] sm:$0xff]  ;;  %vm179_vm4 = vcmask 123904   ;;  %s1014_s30 = smov 64  }
   0x9   :  { %v57_v3 = vpack.c.bf16 %v56_v1, %v56_v1  ;;  %v835_v6 = vld [vmem:[%s1177_s4 + $0x20] sm:$0xff]  ;;  %v834_v7 = vld [vmem:[%s1177_s4 + $0x18] sm:$0xff]  ;;  %v833_v8 = vld [vmem:[%s1177_s4 + $0x10] sm:$0xff]  ;;  %s1015_s12 = smov 96   ;;  %s1018_s2 = smov [#allocation6]   ;;  %vm621_vm5 = vcmask 254976  }
   0xa   :  { %v832_v9 = vld [vmem:[%s1177_s4 + $0x8] sm:$0xff]  ;;  %v831_v10 = vld [vmem:[%s1177_s4] sm:$0xff]  ;;  %v871_v22 = vld [vmem:[#allocation2 + $0xec] sm:$0xf0]  ;;  %s639_s0 = sshll.u32 %s1018_s2, 4  ;;  %s641_s15 = sshll.u32 %s1184_s11, 4  ;;  %s640_s0 = int_to_ptr.vmem [resolvable:$true] %s639_s0  ;;  %s642_s15 = int_to_ptr.hbm [resolvable:$true] %s641_s15 }
   0xb   :  { %660 = vmatmul.msk.bf16.vlgmr.msra.gmra.mxu0 %vm70_vm0, %v57_v3  ;;  %v840_v11 = vld [vmem:[%s1179_s6 + $0x8] sm:$0xff]  ;;  %v839_v12 = vld [vmem:[%s1179_s6] sm:$0xff]  ;;  %v867_v25 = vld [vmem:[#allocation2 + $0xcc] sm:$0xf0]  ;;  %s998_s6 = smov 112   ;;  %s1019_s11 = smov [#allocation5]  }
   0xc   :  { %154 = vmatpush.bf16.msra.mxu1 %v837_v4  ;;  %213 = vmatpush.bf16.msra.mxu2 %v840_v11  ;;  %v181_v13 = vld [vmem:[%s1174_s1] sm:$0x3]  ;;  %v869_v26 = vld [vmem:[#allocation2 + $0xe4] sm:$0xf]  ;;  %v863_v29 = vld [vmem:[#allocation2 + $0xac] sm:$0xf0] }
   0xd   :  { %v182_v14 = vpack.c.bf16 %v181_v13, %v181_v13  ;;  %v915_v15 = vld [vmem:[%s1176_s3] ss:$0 sm:$0xff]  ;;  %v818_v30 = vld [vmem:[#allocation2 + $0xf0] sm:$0xf0]  ;;  %v824_v32 = vld [vmem:[#allocation2 + $0xe8] sm:$0xf] }
   0xe   :  { %v816_v21 = vld [vmem:[#allocation2 + $0xe0] sm:$0xf]  ;;  %v821_v31 = vor.u32 %v869_v26, %v818_v30  ;;  %v872_v33 = vld [vmem:[#allocation2 + $0xf4] sm:$0xf0]  ;;  %v870_v34 = vld [vmem:[#allocation2 + $0xec] sm:$0xf] }
   0xf   :  { %v800_v23 = vld [vmem:[#allocation2 + $0xc0] sm:$0xf]  ;;  %v817_v24 = vor.u32 %v871_v22, %v816_v21  ;;  %v825_v35 = vor.u32 %v872_v33, %v824_v32  ;;  %v826_v36 = vld [vmem:[#allocation2 + $0xf8] sm:$0xf0]  ;;  %v865_v37 = vld [vmem:[#allocation2 + $0xc4] sm:$0xf] }
  0x10   :  { %155 = vmatpush.bf16.msra.mxu1 %v836_v5  ;;  %214 = vmatpush.bf16.msra.mxu2 %v839_v12  ;;  %v801_v27 = vor.u32 %v867_v25, %v800_v23  ;;  %v784_v28 = vld [vmem:[#allocation2 + $0xa0] sm:$0xf]  ;;  %v802_v38 = vld [vmem:[#allocation2 + $0xd0] sm:$0xf0]  ;;  %v829_v40 = vor.u32 %v870_v34, %v826_v36  ;;  %v808_v42 = vld [vmem:[#allocation2 + $0xc8] sm:$0xf]  ;;  %v166_v5 = vlaneseq }
  0x11   :  { %424 = vmatpush.bf16.msra.mxu3 %v817_v24  ;;  %v768_v39 = vld [vmem:[#allocation2 + $0x80] sm:$0xf]  ;;  %437 = vmatpush.bf16.msrb.mxu0 %v821_v31  ;;  %v805_v41 = vor.u32 %v865_v37, %v802_v38  ;;  %v785_v43 = vor.u32 %v863_v29, %v784_v28  ;;  %v868_v44 = vld [vmem:[#allocation2 + $0xd4] sm:$0xf0]  ;;  %v866_v45 = vld [vmem:[#allocation2 + $0xcc] sm:$0xf] }
  0x12   :  { %v810_v46 = vld [vmem:[#allocation2 + $0xd8] sm:$0xf0]  ;;  %v859_v47 = vld [vmem:[#allocation2 + $0x8c] sm:$0xf0]  ;;  %v809_v48 = vor.u32 %v868_v44, %v808_v42  ;;  %v861_v50 = vld [vmem:[#allocation2 + $0xa4] sm:$0xf] }
  0x13   :  { %701 = vmatmul.msk.bf16.vlgmr.msra.gmra.mxu2 %vm203_vm1, %v182_v14  ;;  %v813_v49 = vor.u32 %v866_v45, %v810_v46  ;;  %v786_v51 = vld [vmem:[#allocation2 + $0xb0] sm:$0xf0]  ;;  %v792_v53 = vld [vmem:[#allocation2 + $0xa8] sm:$0xf]  ;;  %v864_v55 = vld [vmem:[#allocation2 + $0xb4] sm:$0xf0]  ;;  %v769_v58 = vor.u32 %v859_v47, %v768_v39 }
  0x14   :  { %156 = vmatpush.bf16.msra.mxu1 %v835_v6  ;;  %450 = vmatpush.bf16.msrb.mxu2 %v825_v35  ;;  %v789_v54 = vor.u32 %v861_v50, %v786_v51  ;;  %v862_v56 = vld [vmem:[#allocation2 + $0xac] sm:$0xf]  ;;  %v794_v57 = vld [vmem:[#allocation2 + $0xb8] sm:$0xf0]  ;;  %v793_v59 = vor.u32 %v864_v55, %v792_v53  ;;  %v857_v60 = vld [vmem:[#allocation2 + $0x84] sm:$0xf] }
  0x15   :  { %425 = vmatpush.bf16.msra.mxu3 %v801_v27  ;;  %438 = vmatpush.bf16.msrb.mxu0 %v805_v41  ;;  %v770_v61 = vld [vmem:[#allocation2 + $0x90] sm:$0xf0]  ;;  %v752_v62 = vld [vmem:[#allocation2 + $0x60] sm:$0xf]  ;;  %v855_v63 = vld [vmem:[#allocation2 + $0x6c] sm:$0xf0]  ;;  %v797_v0 = vor.u32 %v862_v56, %v794_v57 }
  0x16   :  { %v776_v1 = vld [vmem:[#allocation2 + $0x88] sm:$0xf]  ;;  %v860_v2 = vld [vmem:[#allocation2 + $0x94] sm:$0xf0]  ;;  %v858_v3 = vld [vmem:[#allocation2 + $0x8c] sm:$0xf]  ;;  %v773_v6 = vor.u32 %v857_v60, %v770_v61 }
  0x17   :  { %v778_v4 = vld [vmem:[#allocation2 + $0x98] sm:$0xf0]  ;;  %v754_v11 = vld [vmem:[#allocation2 + $0x70] sm:$0xf0]  ;;  %v851_v12 = vld [vmem:[#allocation2 + $0x4c] sm:$0xf0] }
  0x18   :  { %157 = vmatpush.bf16.msra.mxu1 %v834_v7  ;;  %451 = vmatpush.bf16.msrb.mxu2 %v809_v48  ;;  %v753_v7 = vor.u32 %v855_v63, %v752_v62  ;;  %v781_v13 = vor.u32 %v858_v3, %v778_v4  ;;  %v760_v14 = vld [vmem:[#allocation2 + $0x68] sm:$0xf]  ;;  %v720_v23 = vld [vmem:[#allocation2 + $0x20] sm:$0xf]  ;;  %v849_v25 = vld [vmem:[#allocation2 + $0x44] sm:$0xf] }
  0x19   :  { %426 = vmatpush.bf16.msra.mxu3 %v785_v43  ;;  %439 = vmatpush.bf16.msrb.mxu0 %v789_v54  ;;  %v738_v26 = vld [vmem:[#allocation2 + $0x50] sm:$0xf0]  ;;  %v847_v27 = vld [vmem:[#allocation2 + $0x2c] sm:$0xf0]  ;;  %v744_v29 = vld [vmem:[#allocation2 + $0x48] sm:$0xf] }
  0x1a   :  { %v852_v30 = vld [vmem:[#allocation2 + $0x54] sm:$0xf0]  ;;  %v850_v31 = vld [vmem:[#allocation2 + $0x4c] sm:$0xf]  ;;  %v746_v32 = vld [vmem:[#allocation2 + $0x58] sm:$0xf0]  ;;  %v741_v34 = vor.u32 %v849_v25, %v738_v26  ;;  %v721_v35 = vor.u32 %v847_v27, %v720_v23 }
  0x1b   :  { %v704_v36 = vld [vmem:[#allocation2] sm:$0xf]  ;;  %v745_v37 = vor.u32 %v852_v30, %v744_v29  ;;  %v845_v38 = vld [vmem:[#allocation2 + $0x24] sm:$0xf]  ;;  %v722_v39 = vld [vmem:[#allocation2 + $0x30] sm:$0xf0]  ;;  %v749_v42 = vor.u32 %v850_v31, %v746_v32 }
  0x1c   :  { %158 = vmatpush.bf16.msra.mxu1 %v833_v8  ;;  %v736_v8 = vld [vmem:[#allocation2 + $0x40] sm:$0xf]  ;;  %452 = vmatpush.bf16.msrb.mxu2 %v793_v59  ;;  %v843_v41 = vld [vmem:[#allocation2 + $0xc] sm:$0xf0]  ;;  %v728_v43 = vld [vmem:[#allocation2 + $0x28] sm:$0xf]  ;;  %v725_v50 = vor.u32 %v845_v38, %v722_v39 }
  0x1d   :  { %427 = vmatpush.bf16.msra.mxu3 %v769_v58  ;;  %440 = vmatpush.bf16.msrb.mxu0 %v773_v6  ;;  %v737_v22 = vor.u32 %v851_v12, %v736_v8  ;;  %v848_v44 = vld [vmem:[#allocation2 + $0x34] sm:$0xf0]  ;;  %v846_v47 = vld [vmem:[#allocation2 + $0x2c] sm:$0xf]  ;;  %v730_v48 = vld [vmem:[#allocation2 + $0x38] sm:$0xf0]  ;;  %v705_v51 = vor.u32 %v843_v41, %v704_v36 }
  0x1e   :  { %v841_v53 = vld [vmem:[#allocation2 + $0x4] sm:$0xf]  ;;  %v706_v54 = vld [vmem:[#allocation2 + $0x10] sm:$0xf0]  ;;  %v733_v55 = vor.u32 %v846_v47, %v730_v48  ;;  %v712_v56 = vld [vmem:[#allocation2 + $0x8] sm:$0xf] }
  0x1f   :  { %v844_v57 = vld [vmem:[#allocation2 + $0x14] sm:$0xf0]  ;;  %v842_v58 = vld [vmem:[#allocation2 + $0xc] sm:$0xf]  ;;  %v714_v59 = vld [vmem:[#allocation2 + $0x18] sm:$0xf0]  ;;  %v709_v61 = vor.u32 %v841_v53, %v706_v54 }
  0x20   :  { %159 = vmatpush.bf16.msra.mxu1 %v832_v9  ;;  %v777_v9 = vor.u32 %v860_v2, %v776_v1  ;;  %v713_v62 = vor.u32 %v844_v57, %v712_v56  ;;  %v999_v1 = vmov 2   ;;  %v1000_v2 = vmov 1   ;;  %v168_v4 = vld [vmem:[%s1178_s5] sm:$0x3]  ;;  %s628_s16 = sshll.u32 %s1019_s11, 4  ;;  %s630_s19 = sshll.u32 %s1183_s10, 4  ;;  %s629_s16 = int_to_ptr.vmem [resolvable:$true] %s628_s16  ;;  %s631_s19 = int_to_ptr.hbm [resolvable:$true] %s630_s19 }
  0x21   :  { %428 = vmatpush.bf16.msra.mxu3 %v753_v7  ;;  %900 = vset.pattern.permute.xlu2 %v999_v1  ;;  %v1001_v3 = vmov 0   ;;  %v1002_v8 = vmov 5   ;;  %v1006_v12 = vmov 7   ;;  %v1013_v27 = vmov 8  }
  0x22   :  { %453 = vmatpush.bf16.msrb.mxu2 %v777_v9  ;;  %899 = vset.pattern.permute.xlu1 %v1000_v2  ;;  %v1003_v9 = vmov 3   ;;  %v1016_v41 = vmov 12  }
  0x23   :  { %898 = vset.pattern.permute.xlu0 %v1001_v3 }
  0x24   :  { %160 = vmatpush.bf16.msra.mxu1 %v831_v10  ;;  %v853_v10 = vld [vmem:[#allocation2 + $0x64] sm:$0xf] }
  0x25   :  { %v757_v21 = vor.u32 %v853_v10, %v754_v11  ;;  %429 = vmatpush.bf16.msra.mxu3 %v737_v22  ;;  %v1004_v10 = vmov 6   ;;  %v1005_v11 = vmov 9  }
  0x27   :  { %441 = vmatpush.bf16.msrb.mxu0 %v757_v21 }
  0x28   :  { %463 = vmatpush.bf16.msrb.mxu1 %v829_v40 }
  0x29   :  { %430 = vmatpush.bf16.msra.mxu3 %v721_v35 }
  0x2b   :  { %442 = vmatpush.bf16.msrb.mxu0 %v741_v34 }
  0x2c   :  { %464 = vmatpush.bf16.msrb.mxu1 %v813_v49 }
  0x2d   :  { %431 = vmatpush.bf16.msra.mxu3 %v705_v51 }
  0x2f   :  { %443 = vmatpush.bf16.msrb.mxu0 %v725_v50 }
  0x30   :  { %465 = vmatpush.bf16.msrb.mxu1 %v797_v0  ;;  %v717_v0 = vor.u32 %v842_v58, %v714_v59 }
  0x33   :  { %444 = vmatpush.bf16.msrb.mxu0 %v709_v61 }
  0x34   :  { %466 = vmatpush.bf16.msrb.mxu1 %v781_v13  ;;  %v1007_v13 = vmov 13  }
  0x88   :  { %v83_v16 = vpop.f32.mrf.mxu0 }
  0x89   :  { %v84_v17 = vadd.f32 %v915_v15, %v83_v16  ;;  %v856_v15 = vld [vmem:[#allocation2 + $0x74] sm:$0xf0] }
  0x8a   :  { %v761_v24 = vor.u32 %v856_v15, %v760_v14  ;;  %v1008_v15 = vmov 11  }
  0x8b   :  { %v87_v18 = vmax.f32 %v84_v17, 0.0  ;;  %v854_v17 = vld [vmem:[#allocation2 + $0x6c] sm:$0xf] }
  0x8c   :  { %454 = vmatpush.bf16.msrb.mxu2 %v761_v24 }
  0x8d   :  { %v88_v19 = vpack.c.bf16 %v87_v18, %v87_v18  ;;  %v762_v18 = vld [vmem:[#allocation2 + $0x78] sm:$0xf0] }
  0x8e   :  { %v765_v28 = vor.u32 %v854_v17, %v762_v18  ;;  %v1010_v18 = vmov 15  }
  0x8f   :  { %161 = vmatmul.bf16.vlgmr.msra.gmra.mxu1 %v88_v19  ;;  %v167_v19 = vshrl.u32 %v166_v5, 7 }
  0x90   :  { %v85_v20 = vpop.f32.mrf.mxu0  ;;  %467 = vmatpush.bf16.msrb.mxu1 %v765_v28  ;;  %455 = vmatpush.bf16.msrb.mxu2 %v745_v37  ;;  %v254_v28 = vld [vmem:[%s1182_s9] sm:$0xf]  ;;  %s1017_s9 = smov 32  }
  0x91   :  { %v916_v20 = vld [vmem:[%s1180_s7] ss:$0 sm:$0xff]  ;;  %vm169_vm2 = vcmp.eq.s32.totalorder %v167_v19, 0  ;;  %vm172_vm3 = vcmp.eq.s32.totalorder %v167_v19, 1  ;;  %v1011_v19 = vmov 14   ;;  %v256_v29 = vperm.slane %v254_v28, 0 }
  0x92   :  { %v258_v47 = vperm.slane %v254_v28, 2 }
  0x94   :  { %468 = vmatpush.bf16.msrb.mxu1 %v749_v42 }
  0x96   :  { %v216_v52 = vpop.f32.mrf.mxu2 }
  0x97   :  { %v217_v33 = vadd.f32 %v916_v20, %v216_v52  ;;  %v729_v52 = vor.u32 %v848_v44, %v728_v43  ;;  %v1012_v20 = vmov 4  }
  0x98   :  { %469 = vmatpush.bf16.msrb.mxu1 %v733_v55 }
  0x99   :  { %v220_v49 = vmax.f32 %v217_v33, 0.0  ;;  %456 = vmatpush.bf16.msrb.mxu2 %v729_v52  ;;  %v257_v33 = vperm.slane %v254_v28, 1 }
  0x9b   :  { %v221_v60 = vpack.c.bf16 %v220_v49, %v220_v49 }
  0x9c   :  { %470 = vmatpush.bf16.msrb.mxu1 %v717_v0 }
  0x9d   :  { %432 = vmatmul.bf16.vlgmr.msra.gmra.mxu3 %v221_v60  ;;  %457 = vmatpush.bf16.msrb.mxu2 %v713_v62 }
  0x9e   :  { %v218_v16 = vpop.f32.mrf.mxu2  ;;  %445 = vmatmul.bf16.vlgmr.msrb.gmra.mxu0 %v221_v60 }
  0x9f   :  { %471 = vmatmul.bf16.vlgmr.msrb.gmra.mxu1 %v221_v60  ;;  %v1009_v16 = vmov 10  }
  0xa0   :  { %458 = vmatmul.bf16.vlgmr.msrb.gmra.mxu2 %v221_v60 }
 0x10c   :  { %v162_v40 = vpop.f32.mrf.mxu1 }
 0x10d   :  { %v170_v45 = vsel %vm169_vm2, %v162_v40, 0.0  ;;  %v173_v46 = vsel %vm172_vm3, %v162_v40, 0.0 }
 0x10e   :  { %175 = vrot.lane.b32.xlu0 %v173_v46, %s998_s6  ;;  %v171_v5 = vadd.f32 %v170_v45, %v168_v4  ;;  %v259_v45 = vperm.slane %v254_v28, 3 }
 0x114   :  { %v164_v63 = vpop.f32.mrf.mxu1 }
 0x11b   :  { %v446_v21 = vpop.f32.mrf.mxu0 }
 0x11c   :  { %v472_v22 = vpop.f32.mrf.mxu1  ;;  %v447_v34 = vadd.f32 %v446_v21, %v257_v33 }
 0x11d   :  { %v473_v46 = vadd.f32 %v472_v22, %v259_v45 }
 0x120   :  { %v433_v14 = vpop.f32.mrf.mxu3 }
 0x121   :  { %v434_v30 = vadd.f32 %v433_v14, %v256_v29 }
 0x123   :  { %v448_v23 = vpop.f32.mrf.mxu0  ;;  %v459_v24 = vpop.f32.mrf.mxu2 }
 0x124   :  { %v474_v25 = vpop.f32.mrf.mxu1  ;;  %v460_v54 = vadd.f32 %v459_v24, %v258_v47 }
 0x128   :  { %v435_v17 = vpop.f32.mrf.mxu3 }
 0x12b   :  { %v461_v26 = vpop.f32.mrf.mxu2 }
 0x180   :  { %v176_v6 = vpop.permute.xlu0 %175 }
 0x181   :  { %v1133_v7 = vadd.f32 %v176_v6, %v171_v5 }
 0x183   :  { %494 = vperm.xlu2 %900, %v1133_v7   ;;  %484 = vperm.xlu1 %899, %v1133_v7   ;;  %180 = vst.msk [vmem:[#allocation6] sm:$0x3] %vm179_vm4, %v1133_v7 }
 0x184   :  { %478 = vperm.xlu0 %898, %v1133_v7   ;;  %644 = dma.vmem_to_hbm [thread:$0]  %s640_s0, 32, %s642_s15, [#allocation7]  }
 0x18b   :  { %902 = vset.pattern.permute.xlu2 %v1002_v8  ;;  %901 = vset.pattern.permute.xlu1 %v1003_v9 }
 0x18c   :  { %903 = vset.pattern.permute.xlu0 %v1004_v10  ;;  %520 = vperm.xlu2 %902, %v1133_v7  }
 0x18d   :  { %504 = vperm.xlu1 %901, %v1133_v7   ;;  %530 = vperm.xlu0 %903, %v1133_v7  }
 0x194   :  { %905 = vset.pattern.permute.xlu2 %v1005_v11 }
 0x195   :  { %904 = vset.pattern.permute.xlu1 %v1006_v12  ;;  %908 = vset.pattern.permute.xlu0 %v1007_v13 }
 0x196   :  { %556 = vperm.xlu2 %905, %v1133_v7   ;;  %540 = vperm.xlu1 %904, %v1133_v7  }
 0x197   :  { %592 = vperm.xlu0 %908, %v1133_v7  }
 0x19e   :  { %907 = vset.pattern.permute.xlu2 %v1008_v15  ;;  %906 = vset.pattern.permute.xlu1 %v1009_v16 }
 0x19f   :  { %576 = vperm.xlu2 %907, %v1133_v7   ;;  %566 = vperm.xlu1 %906, %v1133_v7  }
 0x1a0   :  { %912 = vset.pattern.permute.xlu0 %v1013_v27 }
 0x1a7   :  { %910 = vset.pattern.permute.xlu2 %v1010_v18  ;;  %909 = vset.pattern.permute.xlu1 %v1011_v19 }
 0x1a8   :  { %612 = vperm.xlu2 %910, %v1133_v7   ;;  %602 = vperm.xlu1 %909, %v1133_v7  }
 0x1b0   :  { %911 = vset.pattern.permute.xlu2 %v1012_v20 }
 0x1b1   :  { %514 = vperm.xlu2 %911, %v1133_v7  }
 0x1b9   :  { %913 = vset.pattern.permute.xlu2 %v1016_v41 }
 0x1dd   :  { %v495_v31 = vpop.permute.xlu2 %494 }
 0x1de   :  { %v497_v32 = vmul.f32 %v495_v31, %v434_v30 }
 0x1e0   :  { %499 = vrot.lane.b32.xlu2 %v497_v32, %s1014_s30 }
 0x1e6   :  { %v521_v35 = vpop.permute.xlu2 %520 }
 0x1e7   :  { %v523_v36 = vmul.f32 %v521_v35, %v447_v34 }
 0x1e9   :  { %525 = vrot.lane.b32.xlu0 %v523_v36, %s1015_s12 }
 0x1f0   :  { %v557_v53 = vpop.permute.xlu2 %556 }
 0x1f1   :  { %550 = vperm.xlu0 %912, %v1133_v7   ;;  %v559_v55 = vmul.f32 %v557_v53, %v460_v54 }
 0x1f5   :  { %v485_v37 = vpop.permute.xlu1 %484 }
 0x1f6   :  { %v487_v38 = vmul.f32 %v485_v37, %v434_v30  ;;  %v479_v39 = vpop.permute.xlu0 %478 }
 0x1f7   :  { %v481_v40 = vmul.f32 %v479_v39, %v434_v30 }
 0x1f8   :  { %489 = vrot.lane.b32.xlu1 %v487_v38, %s1015_s12 }
 0x1f9   :  { %914 = vset.pattern.permute.xlu0 %v1010_v18  ;;  %v577_v58 = vpop.permute.xlu2 %576 }
 0x1fa   :  { %v579_v59 = vmul.f32 %v577_v58, %v460_v54 }
 0x1ff   :  { %v505_v42 = vpop.permute.xlu1 %504  ;;  %v531_v43 = vpop.permute.xlu0 %530 }
 0x200   :  { %v507_v44 = vmul.f32 %v505_v42, %v434_v30  ;;  %v533_v48 = vmul.f32 %v531_v43, %v447_v34 }
 0x202   :  { %509 = vrot.lane.b32.xlu1 %v507_v44, %s1017_s9  ;;  %v613_v61 = vpop.permute.xlu2 %612 }
 0x203   :  { %v615_v63 = vmul.f32 %v613_v61, %v473_v46 }
 0x208   :  { %v541_v49 = vpop.permute.xlu1 %540 }
 0x209   :  { %v543_v50 = vmul.f32 %v541_v49, %v447_v34  ;;  %v593_v51 = vpop.permute.xlu0 %592 }
 0x20a   :  { %v595_v52 = vmul.f32 %v593_v51, %v473_v46  ;;  %535 = vrot.lane.b32.xlu1 %v533_v48, %s1014_s30 }
 0x20b   :  { %545 = vrot.lane.b32.xlu2 %v543_v50, %s1017_s9  ;;  %v515_v0 = vpop.permute.xlu2 %514 }
 0x20c   :  { %597 = vrot.lane.b32.xlu0 %v595_v52, %s1015_s12  ;;  %v517_v6 = vmul.f32 %v515_v0, %v447_v34 }
 0x211   :  { %v567_v56 = vpop.permute.xlu1 %566 }
 0x212   :  { %v569_v57 = vmul.f32 %v567_v56, %v460_v54  ;;  %561 = vrot.lane.b32.xlu1 %v559_v55, %s1015_s12 }
 0x214   :  { %571 = vrot.lane.b32.xlu2 %v569_v57, %s1014_s30 }
 0x21a   :  { %581 = vrot.lane.b32.xlu1 %v579_v59, %s1017_s9  ;;  %v603_v60 = vpop.permute.xlu1 %602 }
 0x21b   :  { %v605_v62 = vmul.f32 %v603_v60, %v473_v46 }
 0x21c   :  { %586 = vperm.xlu2 %913, %v1133_v7  }
 0x222   :  { %607 = vrot.lane.b32.xlu1 %v605_v62, %s1014_s30 }
 0x224   :  { %617 = vrot.lane.b32.xlu2 %v615_v63, %s1017_s9 }
 0x23a   :  { %v500_v2 = vpop.permute.xlu2 %499 }
 0x25b   :  { %v526_v7 = vpop.permute.xlu0 %525 }
 0x263   :  { %v551_v14 = vpop.permute.xlu0 %550 }
 0x264   :  { %v553_v17 = vmul.f32 %v551_v14, %v460_v54 }
 0x265   :  { %v546_v9 = vpop.permute.xlu2 %545 }
 0x26a   :  { %v490_v1 = vpop.permute.xlu1 %489 }
 0x26b   :  { %v492_v3 = vadd.f32 %v490_v1, %v481_v40 }
 0x26d   :  { %v502_v4 = vadd.f32 %v500_v2, %v492_v3 }
 0x26e   :  { %v572_v15 = vpop.permute.xlu2 %571 }
 0x274   :  { %v510_v5 = vpop.permute.xlu1 %509 }
 0x275   :  { %v512_v8 = vadd.f32 %v510_v5, %v502_v4 }
 0x276   :  { %v587_v21 = vpop.permute.xlu2 %586 }
 0x277   :  { %v518_v10 = vadd.f32 %v517_v6, %v512_v8  ;;  %v589_v24 = vmul.f32 %v587_v21, %v473_v46 }
 0x279   :  { %v528_v11 = vadd.f32 %v526_v7, %v518_v10 }
 0x27c   :  { %v536_v12 = vpop.permute.xlu1 %535 }
 0x27d   :  { %v538_v13 = vadd.f32 %v536_v12, %v528_v11 }
 0x27e   :  { %v598_v27 = vpop.permute.xlu0 %597  ;;  %v618_v31 = vpop.permute.xlu2 %617 }
 0x27f   :  { %v548_v16 = vadd.f32 %v546_v9, %v538_v13 }
 0x281   :  { %v554_v19 = vadd.f32 %v553_v17, %v548_v16 }
 0x284   :  { %v562_v18 = vpop.permute.xlu1 %561 }
 0x285   :  { %v564_v20 = vadd.f32 %v562_v18, %v554_v19 }
 0x287   :  { %v574_v22 = vadd.f32 %v572_v15, %v564_v20 }
 0x28c   :  { %v582_v23 = vpop.permute.xlu1 %581 }
 0x28d   :  { %v584_v25 = vadd.f32 %v582_v23, %v574_v22 }
 0x28f   :  { %v590_v26 = vadd.f32 %v589_v24, %v584_v25 }
 0x291   :  { %v600_v28 = vadd.f32 %v598_v27, %v590_v26 }
 0x294   :  { %v608_v29 = vpop.permute.xlu1 %607 }
 0x295   :  { %v610_v30 = vadd.f32 %v608_v29, %v600_v28 }
 0x297   :  { %v620_v32 = vadd.f32 %v618_v31, %v610_v30 }
 0x299   :  { %622 = vst.msk [vmem:[#allocation5] sm:$0x3] %vm621_vm5, %v620_v32 }
 0x29a   :  { %633 = dma.vmem_to_hbm [thread:$0]  %s629_s16, 32, %s631_s19, [#allocation4]  }
 0x29b   :  { %991 = dma.done.wait [#allocation4], 32  }
 0x29c   :  { %992 = vsyncadd [#allocation4], 4294967264 }
 0x29d   :  { %993 = dma.done.wait [#allocation7], 32  }
 0x29e   :  { %994 = vsyncadd [#allocation7], 4294967264 }
 0x29f   :  { %653 = vsyncpa [#allocation3], 1 }
 0x2a0   :  { %654 = vsyncpa [#allocation4], 1 }
 0x2a1   :  { %655 = vsyncpa [#allocation7], 1 }

</bundles_post_ra>
